<compile_context>
chip_gen: v5e
topology: v5e:2x2
jax: 0.10.0
libtpu: 0.0.40
codegen_flags: <defaults>
</compile_context>

<pallas_src>
import jax
import jax.numpy as jnp
from jax.experimental import pallas as pl
from jax.experimental.pallas import tpu as pltpu

LANES = 128
CHUNK = 8                      # sublane rows (128 samples each) per inner step
IN_F, HID_F, OUT_F = 4, 6, 3

# Flat SMEM parameter layout (f32[64]):
W1_OFF = 0                         # w1[k, j] at W1_OFF + k*HID_F + j   (24 vals)
B1_OFF = W1_OFF + IN_F * HID_F     # b1[j]                               (6 vals)
W2_OFF = B1_OFF + HID_F            # w2[k, j] at W2_OFF + k*OUT_F + j   (18 vals)
B2_OFF = W2_OFF + HID_F * OUT_F    # b2[j]                               (3 vals)
P_SIZE = 64


def _round_up(a, m):
    return ((a + m - 1) // m) * m


def iris_mlp_kernel(p_ref, x_ref, o_ref):
    # p_ref: (64,) f32 in SMEM; x_ref: (IN_F, ts, 128); o_ref: (OUT_F, ts, 128)

    # Hoist every parameter scalar out of the chunk loop: sreg-resident values
    # feeding scalar-operand VPU mul/add (no cross-lane broadcasts, no XLU).
    w1 = [[p_ref[W1_OFF + k * HID_F + j] for j in range(HID_F)] for k in range(IN_F)]
    b1 = [p_ref[B1_OFF + j] for j in range(HID_F)]
    w2 = [[p_ref[W2_OFF + k * OUT_F + j] for j in range(OUT_F)] for k in range(HID_F)]
    b2 = [p_ref[B2_OFF + j] for j in range(OUT_F)]

    n_chunks = x_ref.shape[1] // CHUNK

    # Inner loop bounds vreg live ranges while the pipelined DMA block stays big.
    @pl.loop(0, n_chunks)
    def _(c):
        r = pl.multiple_of(c * CHUNK, CHUNK)
        xs = [x_ref[k, pl.ds(r, CHUNK), :] for k in range(IN_F)]   # (CHUNK, 128) each

        # Layer 1: h_j = relu(sum_k w1[k,j] * x_k + b1[j]); two independent
        # partial sums per row to keep the 4-slot VALU fed.
        hs = []
        for j in range(HID_F):
            s0 = xs[0] * w1[0][j] + xs[1] * w1[1][j]
            s1 = xs[2] * w1[2][j] + xs[3] * w1[3][j]
            hs.append(jnp.maximum(s0 + s1 + b1[j], 0.0))

        # Layer 2: out_j = sum_k w2[k,j] * h_k + b2[j]
        for j in range(OUT_F):
            t0 = hs[0] * w2[0][j] + hs[1] * w2[1][j]
            t1 = hs[2] * w2[2][j] + hs[3] * w2[3][j]
            t2 = hs[4] * w2[4][j] + hs[5] * w2[5][j]
            o_ref[j, pl.ds(r, CHUNK), :] = t0 + t1 + t2 + b2[j]


def pack_params(w1, b1, w2, b2):
    p = jnp.zeros((P_SIZE,), jnp.float32)
    p = p.at[W1_OFF:W1_OFF + IN_F * HID_F].set(
        w1.astype(jnp.float32).reshape(-1))
    p = p.at[B1_OFF:B1_OFF + HID_F].set(
        b1.reshape(-1).astype(jnp.float32))
    p = p.at[W2_OFF:W2_OFF + HID_F * OUT_F].set(
        w2.astype(jnp.float32).reshape(-1))
    p = p.at[B2_OFF:B2_OFF + OUT_F].set(
        b2.reshape(-1).astype(jnp.float32))
    return p


def iris_forward(x, w1, b1, w2, b2, *, ts_max=512):
    B = x.shape[0]

    # Samples are packed 128/lane-row; sg = number of 128-sample rows.
    sg = max(1, (B + LANES - 1) // LANES)
    if sg <= 2 * CHUNK:
        ts = _round_up(sg, CHUNK)                       # tiny batch: 1 step
    else:
        # Aim for >=2 grid steps (v7x megacore), cap the block at ts_max rows.
        ts = min(ts_max, _round_up((sg + 1) // 2, CHUNK))
    sg_pad = _round_up(sg, ts)
    Bp = sg_pad * LANES

    # Feature-major slab: (IN_F, Bp) -> (IN_F, sg_pad, 128). ~16 B/sample in.
    xt = jnp.zeros((IN_F, Bp), jnp.float32).at[:, :B].set(
        x.astype(jnp.float32).T)
    x3 = xt.reshape(IN_F, sg_pad, LANES)
    params = pack_params(w1, b1, w2, b2)

    out3 = pl.pallas_call(
        iris_mlp_kernel,
        out_shape=jax.ShapeDtypeStruct((OUT_F, sg_pad, LANES), jnp.float32),
        grid_spec=pltpu.PrefetchScalarGridSpec(
            num_scalar_prefetch=0,
            grid=(sg_pad // ts,),
            in_specs=[
                pl.BlockSpec(memory_space=pltpu.MemorySpace.SMEM),   # params
                pl.BlockSpec((IN_F, ts, LANES), lambda i: (0, i, 0)),
            ],
            out_specs=pl.BlockSpec((OUT_F, ts, LANES), lambda i: (0, i, 0)),
        ),
        compiler_params=pltpu.CompilerParams(
            dimension_semantics=("parallel",)),   # batch axis shards across TCs
    )(params, x3)

    # (OUT_F, sg_pad, 128) -> (B, 3)
    return out3.reshape(OUT_F, Bp)[:, :B].T


def init_params(key):
    # Deterministic init mimicking PyTorch nn.Linear default:
    # U(-1/sqrt(fan_in), 1/sqrt(fan_in)) for both weights and biases.
    k1, k2, k3, k4 = jax.random.split(key, 4)
    bound1 = 1.0 / jnp.sqrt(4.0)
    bound2 = 1.0 / jnp.sqrt(6.0)
    # stored as (in_features, out_features), i.e. PyTorch weight transposed
    w1 = jax.random.uniform(k1, (4, 6), jnp.float32, -bound1, bound1)
    b1 = jax.random.uniform(k2, (1, 6), jnp.float32, -bound1, bound1)
    w2 = jax.random.uniform(k3, (6, 3), jnp.float32, -bound2, bound2)
    b2 = jax.random.uniform(k4, (1, 3), jnp.float32, -bound2, bound2)
    return w1, b1, w2, b2


if __name__ == "__main__":
    key = jax.random.PRNGKey(0)
    k_params, k_x1, k_x2 = jax.random.split(key, 3)
    w1, b1, w2, b2 = init_params(k_params)

    def ref_fn(x):
        return jnp.maximum(x @ w1 + b1, 0.0) @ w2 + b2

    # Matches the script's `x = x[:5]` usage: batch of 5 iris samples, 4 features.
    x_small = jax.random.normal(k_x1, (5, 4), jnp.float32)
    out_small = jax.block_until_ready(iris_forward(x_small, w1, b1, w2, b2))
    assert out_small.shape == (5, 3)
    assert jnp.allclose(out_small, ref_fn(x_small), atol=1e-5, rtol=1e-5)

    # Larger batch: exercises the 2-step parallel grid and multi-chunk inner loop.
    x_big = jax.random.normal(k_x2, (2309, 4), jnp.float32)
    out_big = jax.block_until_ready(iris_forward(x_big, w1, b1, w2, b2))
    assert out_big.shape == (2309, 3)
    assert jnp.allclose(out_big, ref_fn(x_big), atol=1e-4, rtol=1e-4)

    print("KERNEL_OK")
</pallas_src>

<mosaic_0001>
module attributes {stable_mosaic.version = 11 : i64} {
  func.func @iris_mlp_kernel(%arg0: i32, %arg1: memref<64xf32, #tpu.memory_space<smem>>, %arg2: memref<4x8x128xf32, #tpu.memory_space<vmem>>, %arg3: memref<3x8x128xf32, #tpu.memory_space<vmem>>) attributes {dimension_semantics = [#tpu.dimension_semantics<parallel>], iteration_bounds = array<i64: 1>, scalar_prefetch = 0 : i64, scratch_operands = 0 : i64, tpu.core_type = #tpu.core_type<tc>, window_params = [{transform_indices = @transform_0, window_bounds = array<i64: 64>}, {transform_indices = @transform_1, window_bounds = array<i64: 4, 8, 128>}, {transform_indices = @transform_2, window_bounds = array<i64: 3, 8, 128>}]} {
    %c0 = arith.constant 0 : index
    %0 = memref.load %arg1[%c0] : memref<64xf32, #tpu.memory_space<smem>>
    %c1 = arith.constant 1 : index
    %1 = memref.load %arg1[%c1] : memref<64xf32, #tpu.memory_space<smem>>
    %c2 = arith.constant 2 : index
    %2 = memref.load %arg1[%c2] : memref<64xf32, #tpu.memory_space<smem>>
    %c3 = arith.constant 3 : index
    %3 = memref.load %arg1[%c3] : memref<64xf32, #tpu.memory_space<smem>>
    %c4 = arith.constant 4 : index
    %4 = memref.load %arg1[%c4] : memref<64xf32, #tpu.memory_space<smem>>
    %c5 = arith.constant 5 : index
    %5 = memref.load %arg1[%c5] : memref<64xf32, #tpu.memory_space<smem>>
    %c6 = arith.constant 6 : index
    %6 = memref.load %arg1[%c6] : memref<64xf32, #tpu.memory_space<smem>>
    %c7 = arith.constant 7 : index
    %7 = memref.load %arg1[%c7] : memref<64xf32, #tpu.memory_space<smem>>
    %c8 = arith.constant 8 : index
    %8 = memref.load %arg1[%c8] : memref<64xf32, #tpu.memory_space<smem>>
    %c9 = arith.constant 9 : index
    %9 = memref.load %arg1[%c9] : memref<64xf32, #tpu.memory_space<smem>>
    %c10 = arith.constant 10 : index
    %10 = memref.load %arg1[%c10] : memref<64xf32, #tpu.memory_space<smem>>
    %c11 = arith.constant 11 : index
    %11 = memref.load %arg1[%c11] : memref<64xf32, #tpu.memory_space<smem>>
    %c12 = arith.constant 12 : index
    %12 = memref.load %arg1[%c12] : memref<64xf32, #tpu.memory_space<smem>>
    %c13 = arith.constant 13 : index
    %13 = memref.load %arg1[%c13] : memref<64xf32, #tpu.memory_space<smem>>
    %c14 = arith.constant 14 : index
    %14 = memref.load %arg1[%c14] : memref<64xf32, #tpu.memory_space<smem>>
    %c15 = arith.constant 15 : index
    %15 = memref.load %arg1[%c15] : memref<64xf32, #tpu.memory_space<smem>>
    %c16 = arith.constant 16 : index
    %16 = memref.load %arg1[%c16] : memref<64xf32, #tpu.memory_space<smem>>
    %c17 = arith.constant 17 : index
    %17 = memref.load %arg1[%c17] : memref<64xf32, #tpu.memory_space<smem>>
    %c18 = arith.constant 18 : index
    %18 = memref.load %arg1[%c18] : memref<64xf32, #tpu.memory_space<smem>>
    %c19 = arith.constant 19 : index
    %19 = memref.load %arg1[%c19] : memref<64xf32, #tpu.memory_space<smem>>
    %c20 = arith.constant 20 : index
    %20 = memref.load %arg1[%c20] : memref<64xf32, #tpu.memory_space<smem>>
    %c21 = arith.constant 21 : index
    %21 = memref.load %arg1[%c21] : memref<64xf32, #tpu.memory_space<smem>>
    %c22 = arith.constant 22 : index
    %22 = memref.load %arg1[%c22] : memref<64xf32, #tpu.memory_space<smem>>
    %c23 = arith.constant 23 : index
    %23 = memref.load %arg1[%c23] : memref<64xf32, #tpu.memory_space<smem>>
    %c24 = arith.constant 24 : index
    %24 = memref.load %arg1[%c24] : memref<64xf32, #tpu.memory_space<smem>>
    %c25 = arith.constant 25 : index
    %25 = memref.load %arg1[%c25] : memref<64xf32, #tpu.memory_space<smem>>
    %c26 = arith.constant 26 : index
    %26 = memref.load %arg1[%c26] : memref<64xf32, #tpu.memory_space<smem>>
    %c27 = arith.constant 27 : index
    %27 = memref.load %arg1[%c27] : memref<64xf32, #tpu.memory_space<smem>>
    %c28 = arith.constant 28 : index
    %28 = memref.load %arg1[%c28] : memref<64xf32, #tpu.memory_space<smem>>
    %c29 = arith.constant 29 : index
    %29 = memref.load %arg1[%c29] : memref<64xf32, #tpu.memory_space<smem>>
    %c30 = arith.constant 30 : index
    %30 = memref.load %arg1[%c30] : memref<64xf32, #tpu.memory_space<smem>>
    %c31 = arith.constant 31 : index
    %31 = memref.load %arg1[%c31] : memref<64xf32, #tpu.memory_space<smem>>
    %c32 = arith.constant 32 : index
    %32 = memref.load %arg1[%c32] : memref<64xf32, #tpu.memory_space<smem>>
    %c33 = arith.constant 33 : index
    %33 = memref.load %arg1[%c33] : memref<64xf32, #tpu.memory_space<smem>>
    %c34 = arith.constant 34 : index
    %34 = memref.load %arg1[%c34] : memref<64xf32, #tpu.memory_space<smem>>
    %c35 = arith.constant 35 : index
    %35 = memref.load %arg1[%c35] : memref<64xf32, #tpu.memory_space<smem>>
    %c36 = arith.constant 36 : index
    %36 = memref.load %arg1[%c36] : memref<64xf32, #tpu.memory_space<smem>>
    %c37 = arith.constant 37 : index
    %37 = memref.load %arg1[%c37] : memref<64xf32, #tpu.memory_space<smem>>
    %c38 = arith.constant 38 : index
    %38 = memref.load %arg1[%c38] : memref<64xf32, #tpu.memory_space<smem>>
    %c39 = arith.constant 39 : index
    %39 = memref.load %arg1[%c39] : memref<64xf32, #tpu.memory_space<smem>>
    %c40 = arith.constant 40 : index
    %40 = memref.load %arg1[%c40] : memref<64xf32, #tpu.memory_space<smem>>
    %c41 = arith.constant 41 : index
    %41 = memref.load %arg1[%c41] : memref<64xf32, #tpu.memory_space<smem>>
    %c42 = arith.constant 42 : index
    %42 = memref.load %arg1[%c42] : memref<64xf32, #tpu.memory_space<smem>>
    %c43 = arith.constant 43 : index
    %43 = memref.load %arg1[%c43] : memref<64xf32, #tpu.memory_space<smem>>
    %c44 = arith.constant 44 : index
    %44 = memref.load %arg1[%c44] : memref<64xf32, #tpu.memory_space<smem>>
    %c45 = arith.constant 45 : index
    %45 = memref.load %arg1[%c45] : memref<64xf32, #tpu.memory_space<smem>>
    %c46 = arith.constant 46 : index
    %46 = memref.load %arg1[%c46] : memref<64xf32, #tpu.memory_space<smem>>
    %c47 = arith.constant 47 : index
    %47 = memref.load %arg1[%c47] : memref<64xf32, #tpu.memory_space<smem>>
    %c48 = arith.constant 48 : index
    %48 = memref.load %arg1[%c48] : memref<64xf32, #tpu.memory_space<smem>>
    %c49 = arith.constant 49 : index
    %49 = memref.load %arg1[%c49] : memref<64xf32, #tpu.memory_space<smem>>
    %c50 = arith.constant 50 : index
    %50 = memref.load %arg1[%c50] : memref<64xf32, #tpu.memory_space<smem>>
    %c0_i32 = arith.constant 0 : i32
    %c1_i32 = arith.constant 1 : i32
    %51 = arith.muli %c0_i32, %c1_i32 : i32
    %c0_i32_0 = arith.constant 0 : i32
    %52 = arith.addi %c0_i32_0, %51 : i32
    %c8_i32 = arith.constant 8 : i32
    %53 = arith.muli %52, %c8_i32 : i32
    %54 = tpu.assume_multiple %53, 8 : i32
    %c0_1 = arith.constant 0 : index
    %55 = arith.index_cast %54 : i32 to index
    %c0_2 = arith.constant 0 : index
    %56 = vector.load %arg2[%c0_1, %55, %c0_2] : memref<4x8x128xf32, #tpu.memory_space<vmem>>, vector<1x8x128xf32>
    %57 = vector.shape_cast %56 : vector<1x8x128xf32> to vector<8x128xf32>
    %c1_3 = arith.constant 1 : index
    %58 = arith.index_cast %54 : i32 to index
    %c0_4 = arith.constant 0 : index
    %59 = vector.load %arg2[%c1_3, %58, %c0_4] : memref<4x8x128xf32, #tpu.memory_space<vmem>>, vector<1x8x128xf32>
    %60 = vector.shape_cast %59 : vector<1x8x128xf32> to vector<8x128xf32>
    %c2_5 = arith.constant 2 : index
    %61 = arith.index_cast %54 : i32 to index
    %c0_6 = arith.constant 0 : index
    %62 = vector.load %arg2[%c2_5, %61, %c0_6] : memref<4x8x128xf32, #tpu.memory_space<vmem>>, vector<1x8x128xf32>
    %63 = vector.shape_cast %62 : vector<1x8x128xf32> to vector<8x128xf32>
    %c3_7 = arith.constant 3 : index
    %64 = arith.index_cast %54 : i32 to index
    %c0_8 = arith.constant 0 : index
    %65 = vector.load %arg2[%c3_7, %64, %c0_8] : memref<4x8x128xf32, #tpu.memory_space<vmem>>, vector<1x8x128xf32>
    %66 = vector.shape_cast %65 : vector<1x8x128xf32> to vector<8x128xf32>
    %67 = vector.broadcast %0 : f32 to vector<8x128xf32>
    %68 = arith.mulf %57, %67 : vector<8x128xf32>
    %69 = vector.broadcast %6 : f32 to vector<8x128xf32>
    %70 = arith.mulf %60, %69 : vector<8x128xf32>
    %71 = arith.addf %68, %70 : vector<8x128xf32>
    %72 = vector.broadcast %12 : f32 to vector<8x128xf32>
    %73 = arith.mulf %63, %72 : vector<8x128xf32>
    %74 = vector.broadcast %18 : f32 to vector<8x128xf32>
    %75 = arith.mulf %66, %74 : vector<8x128xf32>
    %76 = arith.addf %73, %75 : vector<8x128xf32>
    %77 = arith.addf %71, %76 : vector<8x128xf32>
    %78 = vector.broadcast %24 : f32 to vector<8x128xf32>
    %79 = arith.addf %77, %78 : vector<8x128xf32>
    %cst = arith.constant 0.000000e+00 : f32
    %80 = vector.broadcast %cst : f32 to vector<8x128xf32>
    %81 = arith.maximumf %79, %80 : vector<8x128xf32>
    %82 = vector.broadcast %1 : f32 to vector<8x128xf32>
    %83 = arith.mulf %57, %82 : vector<8x128xf32>
    %84 = vector.broadcast %7 : f32 to vector<8x128xf32>
    %85 = arith.mulf %60, %84 : vector<8x128xf32>
    %86 = arith.addf %83, %85 : vector<8x128xf32>
    %87 = vector.broadcast %13 : f32 to vector<8x128xf32>
    %88 = arith.mulf %63, %87 : vector<8x128xf32>
    %89 = vector.broadcast %19 : f32 to vector<8x128xf32>
    %90 = arith.mulf %66, %89 : vector<8x128xf32>
    %91 = arith.addf %88, %90 : vector<8x128xf32>
    %92 = arith.addf %86, %91 : vector<8x128xf32>
    %93 = vector.broadcast %25 : f32 to vector<8x128xf32>
    %94 = arith.addf %92, %93 : vector<8x128xf32>
    %cst_9 = arith.constant 0.000000e+00 : f32
    %95 = vector.broadcast %cst_9 : f32 to vector<8x128xf32>
    %96 = arith.maximumf %94, %95 : vector<8x128xf32>
    %97 = vector.broadcast %2 : f32 to vector<8x128xf32>
    %98 = arith.mulf %57, %97 : vector<8x128xf32>
    %99 = vector.broadcast %8 : f32 to vector<8x128xf32>
    %100 = arith.mulf %60, %99 : vector<8x128xf32>
    %101 = arith.addf %98, %100 : vector<8x128xf32>
    %102 = vector.broadcast %14 : f32 to vector<8x128xf32>
    %103 = arith.mulf %63, %102 : vector<8x128xf32>
    %104 = vector.broadcast %20 : f32 to vector<8x128xf32>
    %105 = arith.mulf %66, %104 : vector<8x128xf32>
    %106 = arith.addf %103, %105 : vector<8x128xf32>
    %107 = arith.addf %101, %106 : vector<8x128xf32>
    %108 = vector.broadcast %26 : f32 to vector<8x128xf32>
    %109 = arith.addf %107, %108 : vector<8x128xf32>
    %cst_10 = arith.constant 0.000000e+00 : f32
    %110 = vector.broadcast %cst_10 : f32 to vector<8x128xf32>
    %111 = arith.maximumf %109, %110 : vector<8x128xf32>
    %112 = vector.broadcast %3 : f32 to vector<8x128xf32>
    %113 = arith.mulf %57, %112 : vector<8x128xf32>
    %114 = vector.broadcast %9 : f32 to vector<8x128xf32>
    %115 = arith.mulf %60, %114 : vector<8x128xf32>
    %116 = arith.addf %113, %115 : vector<8x128xf32>
    %117 = vector.broadcast %15 : f32 to vector<8x128xf32>
    %118 = arith.mulf %63, %117 : vector<8x128xf32>
    %119 = vector.broadcast %21 : f32 to vector<8x128xf32>
    %120 = arith.mulf %66, %119 : vector<8x128xf32>
    %121 = arith.addf %118, %120 : vector<8x128xf32>
    %122 = arith.addf %116, %121 : vector<8x128xf32>
    %123 = vector.broadcast %27 : f32 to vector<8x128xf32>
    %124 = arith.addf %122, %123 : vector<8x128xf32>
    %cst_11 = arith.constant 0.000000e+00 : f32
    %125 = vector.broadcast %cst_11 : f32 to vector<8x128xf32>
    %126 = arith.maximumf %124, %125 : vector<8x128xf32>
    %127 = vector.broadcast %4 : f32 to vector<8x128xf32>
    %128 = arith.mulf %57, %127 : vector<8x128xf32>
    %129 = vector.broadcast %10 : f32 to vector<8x128xf32>
    %130 = arith.mulf %60, %129 : vector<8x128xf32>
    %131 = arith.addf %128, %130 : vector<8x128xf32>
    %132 = vector.broadcast %16 : f32 to vector<8x128xf32>
    %133 = arith.mulf %63, %132 : vector<8x128xf32>
    %134 = vector.broadcast %22 : f32 to vector<8x128xf32>
    %135 = arith.mulf %66, %134 : vector<8x128xf32>
    %136 = arith.addf %133, %135 : vector<8x128xf32>
    %137 = arith.addf %131, %136 : vector<8x128xf32>
    %138 = vector.broadcast %28 : f32 to vector<8x128xf32>
    %139 = arith.addf %137, %138 : vector<8x128xf32>
    %cst_12 = arith.constant 0.000000e+00 : f32
    %140 = vector.broadcast %cst_12 : f32 to vector<8x128xf32>
    %141 = arith.maximumf %139, %140 : vector<8x128xf32>
    %142 = vector.broadcast %5 : f32 to vector<8x128xf32>
    %143 = arith.mulf %57, %142 : vector<8x128xf32>
    %144 = vector.broadcast %11 : f32 to vector<8x128xf32>
    %145 = arith.mulf %60, %144 : vector<8x128xf32>
    %146 = arith.addf %143, %145 : vector<8x128xf32>
    %147 = vector.broadcast %17 : f32 to vector<8x128xf32>
    %148 = arith.mulf %63, %147 : vector<8x128xf32>
    %149 = vector.broadcast %23 : f32 to vector<8x128xf32>
    %150 = arith.mulf %66, %149 : vector<8x128xf32>
    %151 = arith.addf %148, %150 : vector<8x128xf32>
    %152 = arith.addf %146, %151 : vector<8x128xf32>
    %153 = vector.broadcast %29 : f32 to vector<8x128xf32>
    %154 = arith.addf %152, %153 : vector<8x128xf32>
    %cst_13 = arith.constant 0.000000e+00 : f32
    %155 = vector.broadcast %cst_13 : f32 to vector<8x128xf32>
    %156 = arith.maximumf %154, %155 : vector<8x128xf32>
    %157 = vector.broadcast %30 : f32 to vector<8x128xf32>
    %158 = arith.mulf %81, %157 : vector<8x128xf32>
    %159 = vector.broadcast %33 : f32 to vector<8x128xf32>
    %160 = arith.mulf %96, %159 : vector<8x128xf32>
    %161 = arith.addf %158, %160 : vector<8x128xf32>
    %162 = vector.broadcast %36 : f32 to vector<8x128xf32>
    %163 = arith.mulf %111, %162 : vector<8x128xf32>
    %164 = vector.broadcast %39 : f32 to vector<8x128xf32>
    %165 = arith.mulf %126, %164 : vector<8x128xf32>
    %166 = arith.addf %163, %165 : vector<8x128xf32>
    %167 = vector.broadcast %42 : f32 to vector<8x128xf32>
    %168 = arith.mulf %141, %167 : vector<8x128xf32>
    %169 = vector.broadcast %45 : f32 to vector<8x128xf32>
    %170 = arith.mulf %156, %169 : vector<8x128xf32>
    %171 = arith.addf %168, %170 : vector<8x128xf32>
    %172 = arith.addf %161, %166 : vector<8x128xf32>
    %173 = arith.addf %172, %171 : vector<8x128xf32>
    %174 = vector.broadcast %48 : f32 to vector<8x128xf32>
    %175 = arith.addf %173, %174 : vector<8x128xf32>
    %c0_14 = arith.constant 0 : index
    %176 = arith.index_cast %54 : i32 to index
    %c0_15 = arith.constant 0 : index
    %177 = vector.load %arg3[%c0_14, %176, %c0_15] : memref<3x8x128xf32, #tpu.memory_space<vmem>>, vector<1x8x128xf32>
    %178 = vector.shape_cast %177 : vector<1x8x128xf32> to vector<8x128xf32>
    %179 = vector.shape_cast %175 : vector<8x128xf32> to vector<1x8x128xf32>
    tpu.vector_store %arg3[%c0_14, %176, %c0_15], %179 {strides = array<i32>} : memref<3x8x128xf32, #tpu.memory_space<vmem>>, vector<1x8x128xf32>,
    %180 = vector.broadcast %31 : f32 to vector<8x128xf32>
    %181 = arith.mulf %81, %180 : vector<8x128xf32>
    %182 = vector.broadcast %34 : f32 to vector<8x128xf32>
    %183 = arith.mulf %96, %182 : vector<8x128xf32>
    %184 = arith.addf %181, %183 : vector<8x128xf32>
    %185 = vector.broadcast %37 : f32 to vector<8x128xf32>
    %186 = arith.mulf %111, %185 : vector<8x128xf32>
    %187 = vector.broadcast %40 : f32 to vector<8x128xf32>
    %188 = arith.mulf %126, %187 : vector<8x128xf32>
    %189 = arith.addf %186, %188 : vector<8x128xf32>
    %190 = vector.broadcast %43 : f32 to vector<8x128xf32>
    %191 = arith.mulf %141, %190 : vector<8x128xf32>
    %192 = vector.broadcast %46 : f32 to vector<8x128xf32>
    %193 = arith.mulf %156, %192 : vector<8x128xf32>
    %194 = arith.addf %191, %193 : vector<8x128xf32>
    %195 = arith.addf %184, %189 : vector<8x128xf32>
    %196 = arith.addf %195, %194 : vector<8x128xf32>
    %197 = vector.broadcast %49 : f32 to vector<8x128xf32>
    %198 = arith.addf %196, %197 : vector<8x128xf32>
    %c1_16 = arith.constant 1 : index
    %199 = arith.index_cast %54 : i32 to index
    %c0_17 = arith.constant 0 : index
    %200 = vector.load %arg3[%c1_16, %199, %c0_17] : memref<3x8x128xf32, #tpu.memory_space<vmem>>, vector<1x8x128xf32>
    %201 = vector.shape_cast %200 : vector<1x8x128xf32> to vector<8x128xf32>
    %202 = vector.shape_cast %198 : vector<8x128xf32> to vector<1x8x128xf32>
    tpu.vector_store %arg3[%c1_16, %199, %c0_17], %202 {strides = array<i32>} : memref<3x8x128xf32, #tpu.memory_space<vmem>>, vector<1x8x128xf32>,
    %203 = vector.broadcast %32 : f32 to vector<8x128xf32>
    %204 = arith.mulf %81, %203 : vector<8x128xf32>
    %205 = vector.broadcast %35 : f32 to vector<8x128xf32>
    %206 = arith.mulf %96, %205 : vector<8x128xf32>
    %207 = arith.addf %204, %206 : vector<8x128xf32>
    %208 = vector.broadcast %38 : f32 to vector<8x128xf32>
    %209 = arith.mulf %111, %208 : vector<8x128xf32>
    %210 = vector.broadcast %41 : f32 to vector<8x128xf32>
    %211 = arith.mulf %126, %210 : vector<8x128xf32>
    %212 = arith.addf %209, %211 : vector<8x128xf32>
    %213 = vector.broadcast %44 : f32 to vector<8x128xf32>
    %214 = arith.mulf %141, %213 : vector<8x128xf32>
    %215 = vector.broadcast %47 : f32 to vector<8x128xf32>
    %216 = arith.mulf %156, %215 : vector<8x128xf32>
    %217 = arith.addf %214, %216 : vector<8x128xf32>
    %218 = arith.addf %207, %212 : vector<8x128xf32>
    %219 = arith.addf %218, %217 : vector<8x128xf32>
    %220 = vector.broadcast %50 : f32 to vector<8x128xf32>
    %221 = arith.addf %219, %220 : vector<8x128xf32>
    %c2_18 = arith.constant 2 : index
    %222 = arith.index_cast %54 : i32 to index
    %c0_19 = arith.constant 0 : index
    %223 = vector.load %arg3[%c2_18, %222, %c0_19] : memref<3x8x128xf32, #tpu.memory_space<vmem>>, vector<1x8x128xf32>
    %224 = vector.shape_cast %223 : vector<1x8x128xf32> to vector<8x128xf32>
    %225 = vector.shape_cast %221 : vector<8x128xf32> to vector<1x8x128xf32>
    tpu.vector_store %arg3[%c2_18, %222, %c0_19], %225 {strides = array<i32>} : memref<3x8x128xf32, #tpu.memory_space<vmem>>, vector<1x8x128xf32>,
    %c1_i32_20 = arith.constant 1 : i32
    return
  }
  func.func @transform_0(%arg0: i32) -> i32 {
    %c0_i32 = arith.constant 0 : i32
    %c0_i32_0 = arith.constant 0 : i32
    return %c0_i32 : i32
  }
  func.func @transform_1(%arg0: i32) -> (i32, i32, i32) {
    %c0_i32 = arith.constant 0 : i32
    %c0_i32_0 = arith.constant 0 : i32
    %c0_i32_1 = arith.constant 0 : i32
    return %c0_i32, %arg0, %c0_i32_0 : i32, i32, i32
  }
  func.func @transform_2(%arg0: i32) -> (i32, i32, i32) {
    %c0_i32 = arith.constant 0 : i32
    %c0_i32_0 = arith.constant 0 : i32
    %c0_i32_1 = arith.constant 0 : i32
    return %c0_i32, %arg0, %c0_i32_0 : i32, i32, i32
  }
}

</mosaic_0001>

<bundles_post_ra>
// kernel: tpu_custom_call.1
= control target key start
LH: loop header
LB: loop body
LE: loop exit
PB: predicated region body
PF: predicated region fallthrough
CT: control target
= control target key end

     0   :  { %7 = vsyncpa [#allocation5], 0  ;;  %s549_s0 = inlined_call_operand.hbm [shape: f32[64], index: 0, kind: input, shape index: {}]   ;;  %s550_s1 = inlined_call_operand.hbm [shape: f32[4,8,128], index: 1, kind: input, shape index: {}]   ;;  %s551_s2 = inlined_call_operand.hbm [shape: f32[3,8,128], index: 2, kind: output, shape index: {}]  }
   0x1   :  { %8 = vsyncpa [#allocation3], 0 }
   0x2   :  { %9 = vsyncpa [#allocation4], 0  ;;  %s15_s11 = sshll.u32 %s549_s0, 4  ;;  %s23_s14 = sshll.u32 %s550_s1, 4  ;;  %s16_s11 = int_to_ptr.hbm [resolvable:$true] %s15_s11  ;;  %s24_s14 = int_to_ptr.hbm [resolvable:$true] %s23_s14 }
   0x3   :  { %s394_s15 = smov [#allocation2]   ;;  %s395_s16 = smov [#allocation6]  }
   0x4   :  { %18 = dma.hbm_to_smem %s16_s11, 16, %s394_s15, [#allocation5]  }
   0x5   :  { %s25_s17 = sshll.u32 %s395_s16, 4  ;;  %s396_s18 = smov 128   ;;  %s26_s17 = int_to_ptr.vmem [resolvable:$true] %s25_s17 }
   0x6   :  { %s397_s19 = smov 8  }
   0x7   :  { %31 = dma.hbm_to_vmem [thread:$0]  %s24_s14, 512, %s26_s17, [#allocation3], %s396_s18, %s396_s18, %s397_s19  }
   0x8   :  { %388 = dma.done.wait [#allocation5], 16  }
   0x9   :  { %389 = vsyncadd [#allocation5], 4294967280 }
   0xa   :  { %390 = dma.done.wait [#allocation3], 512  }
   0xb   :  { %391 = vsyncadd [#allocation3], 4294966784 }
   0xc   :  { %40 = sfence }
   0xd   :  { %s41_s0 = sld [smem:[#allocation2]]  ;;  %v92_v0 = vld [vmem:[#allocation6] sm:$0xff]  ;;  %v95_v3 = vld [vmem:[#allocation6 + $0x8] sm:$0xff]  ;;  %v98_v22 = vld [vmem:[#allocation6 + $0x10] sm:$0xff] }
   0xe   :  { %s273_s20 = sld [smem:[#allocation2 + $0x1]]  ;;  %v101_v28 = vld [vmem:[#allocation6 + $0x18] sm:$0xff] }
   0xf   :  { %s423_s1 = sld [smem:[#allocation2 + $0x2]] }
  0x10   :  { %s425_s21 = sld [smem:[#allocation2 + $0x3]] }
  0x11   :  { %s427_s22 = sld [smem:[#allocation2 + $0x4]] }
  0x12   :  { %s429_s23 = sld [smem:[#allocation2 + $0x5]] }
  0x13   :  { %s278_s24 = sld [smem:[#allocation2 + $0x6]]  ;;  %v102_v1 = vstv %s41_s0 }
  0x14   :  { %s279_s25 = sld [smem:[#allocation2 + $0x7]]  ;;  %v116_v2 = vstv %s273_s20  ;;  %v103_v10 = vmul.f32 %v102_v1, %v92_v0 }
  0x15   :  { %s280_s26 = sld [smem:[#allocation2 + $0x8]]  ;;  %v130_v6 = vstv %s423_s1  ;;  %v117_v11 = vmul.f32 %v116_v2, %v92_v0 }
  0x16   :  { %s431_s27 = sld [smem:[#allocation2 + $0x9]]  ;;  %v144_v8 = vstv %s425_s21  ;;  %v131_v16 = vmul.f32 %v130_v6, %v92_v0 }
  0x17   :  { %s433_s28 = sld [smem:[#allocation2 + $0xa]]  ;;  %v158_v12 = vstv %s427_s22  ;;  %v145_v19 = vmul.f32 %v144_v8, %v92_v0 }
  0x18   :  { %s435_s29 = sld [smem:[#allocation2 + $0xb]]  ;;  %v172_v17 = vstv %s429_s23  ;;  %v159_v24 = vmul.f32 %v158_v12, %v92_v0 }
  0x19   :  { %s437_s30 = sld [smem:[#allocation2 + $0xc]]  ;;  %v104_v4 = vstv %s278_s24  ;;  %v173_v27 = vmul.f32 %v172_v17, %v92_v0 }
  0x1a   :  { %s439_s3 = sld [smem:[#allocation2 + $0xd]]  ;;  %v118_v5 = vstv %s279_s25  ;;  %v105_v14 = vmul.f32 %v104_v4, %v95_v3 }
  0x1b   :  { %s441_s4 = sld [smem:[#allocation2 + $0xe]]  ;;  %v132_v7 = vstv %s280_s26  ;;  %v119_v15 = vmul.f32 %v118_v5, %v95_v3 }
  0x1c   :  { %s443_s5 = sld [smem:[#allocation2 + $0xf]]  ;;  %v146_v9 = vstv %s431_s27  ;;  %v133_v18 = vmul.f32 %v132_v7, %v95_v3  ;;  %v106_v29 = vadd.f32 %v105_v14, %v103_v10 }
  0x1d   :  { %s446_s6 = sld [smem:[#allocation2 + $0x10]]  ;;  %v160_v13 = vstv %s433_s28  ;;  %v147_v20 = vmul.f32 %v146_v9, %v95_v3  ;;  %v120_v30 = vadd.f32 %v119_v15, %v117_v11 }
  0x1e   :  { %s450_s7 = sld [smem:[#allocation2 + $0x11]]  ;;  %v174_v21 = vstv %s435_s29  ;;  %v161_v25 = vmul.f32 %v160_v13, %v95_v3  ;;  %v134_v34 = vadd.f32 %v133_v18, %v131_v16 }
  0x1f   :  { %s454_s8 = sld [smem:[#allocation2 + $0x12]]  ;;  %v107_v23 = vstv %s437_s30  ;;  %v175_v32 = vmul.f32 %v174_v21, %v95_v3  ;;  %v148_v35 = vadd.f32 %v147_v20, %v145_v19 }
  0x20   :  { %s457_s9 = sld [smem:[#allocation2 + $0x13]]  ;;  %v121_v26 = vstv %s439_s3  ;;  %v108_v33 = vmul.f32 %v107_v23, %v98_v22  ;;  %v162_v39 = vadd.f32 %v161_v25, %v159_v24 }
  0x21   :  { %s460_s10 = sld [smem:[#allocation2 + $0x14]]  ;;  %v135_v31 = vstv %s441_s4  ;;  %v122_v38 = vmul.f32 %v121_v26, %v98_v22  ;;  %v176_v48 = vadd.f32 %v175_v32, %v173_v27 }
  0x22   :  { %s463_s11 = sld [smem:[#allocation2 + $0x15]]  ;;  %v149_v36 = vstv %s443_s5  ;;  %v136_v43 = vmul.f32 %v135_v31, %v98_v22 }
  0x23   :  { %s466_s12 = sld [smem:[#allocation2 + $0x16]]  ;;  %v163_v40 = vstv %s446_s6  ;;  %v150_v47 = vmul.f32 %v149_v36, %v98_v22 }
  0x24   :  { %s469_s13 = sld [smem:[#allocation2 + $0x17]]  ;;  %v177_v44 = vstv %s450_s7  ;;  %v164_v52 = vmul.f32 %v163_v40, %v98_v22 }
  0x25   :  { %s472_s14 = sld [smem:[#allocation2 + $0x18]]  ;;  %v109_v37 = vstv %s454_s8  ;;  %v178_v56 = vmul.f32 %v177_v44, %v98_v22 }
  0x26   :  { %s476_s15 = sld [smem:[#allocation2 + $0x19]]  ;;  %v110_v41 = vmul.f32 %v109_v37, %v101_v28  ;;  %v123_v42 = vstv %s457_s9 }
  0x27   :  { %s480_s16 = sld [smem:[#allocation2 + $0x1a]]  ;;  %v124_v45 = vmul.f32 %v123_v42, %v101_v28  ;;  %v137_v46 = vstv %s460_s10 }
  0x28   :  { %s483_s17 = sld [smem:[#allocation2 + $0x1b]]  ;;  %v111_v49 = vadd.f32 %v110_v41, %v108_v33  ;;  %v138_v50 = vmul.f32 %v137_v46, %v101_v28  ;;  %v151_v51 = vstv %s463_s11 }
  0x29   :  { %s486_s0 = sld [smem:[#allocation2 + $0x1c]]  ;;  %v125_v53 = vadd.f32 %v124_v45, %v122_v38  ;;  %v152_v54 = vmul.f32 %v151_v51, %v101_v28  ;;  %v165_v55 = vstv %s466_s12 }
  0x2a   :  { %s489_s20 = sld [smem:[#allocation2 + $0x1d]]  ;;  %v112_v57 = vadd.f32 %v111_v49, %v106_v29  ;;  %v139_v58 = vadd.f32 %v138_v50, %v136_v43  ;;  %v166_v59 = vmul.f32 %v165_v55, %v101_v28  ;;  %v179_v60 = vstv %s469_s13  ;;  %s398_s13 = smov [#allocation7]  }
  0x2b   :  { %s492_s1 = sld [smem:[#allocation2 + $0x1e]]  ;;  %v113_v61 = vstv %s472_s14  ;;  %v126_v62 = vadd.f32 %v125_v53, %v120_v30  ;;  %v153_v63 = vadd.f32 %v152_v54, %v150_v47  ;;  %v180_v0 = vmul.f32 %v179_v60, %v101_v28  ;;  %s252_s14 = sshll.u32 %s398_s13, 4  ;;  %s253_s14 = int_to_ptr.vmem [resolvable:$true] %s252_s14 }
  0x2c   :  { %s495_s21 = sld [smem:[#allocation2 + $0x21]]  ;;  %v114_v1 = vadd.f32 %v113_v61, %v112_v57  ;;  %v127_v2 = vstv %s476_s15  ;;  %v140_v3 = vadd.f32 %v139_v58, %v134_v34  ;;  %v167_v4 = vadd.f32 %v166_v59, %v164_v52 }
  0x2d   :  { %s498_s22 = sld [smem:[#allocation2 + $0x24]]  ;;  %v128_v5 = vadd.f32 %v127_v2, %v126_v62  ;;  %v141_v6 = vstv %s480_s16  ;;  %v154_v7 = vadd.f32 %v153_v63, %v148_v35  ;;  %v181_v8 = vadd.f32 %v180_v0, %v178_v56 }
  0x2e   :  { %s311_s23 = sld [smem:[#allocation2 + $0x27]]  ;;  %v501_v9 = vmax.f32 %v114_v1, 0.0  ;;  %v142_v10 = vadd.f32 %v141_v6, %v140_v3  ;;  %v155_v11 = vstv %s483_s17  ;;  %v168_v12 = vadd.f32 %v167_v4, %v162_v39  ;;  %s254_s17 = sshll.u32 %s551_s2, 4  ;;  %s255_s17 = int_to_ptr.hbm [resolvable:$true] %s254_s17 }
  0x2f   :  { %s314_s24 = sld [smem:[#allocation2 + $0x2a]]  ;;  %v504_v13 = vmax.f32 %v128_v5, 0.0  ;;  %v156_v14 = vadd.f32 %v155_v11, %v154_v7  ;;  %v169_v15 = vstv %s486_s0  ;;  %v182_v16 = vadd.f32 %v181_v8, %v176_v48 }
  0x30   :  { %s317_s25 = sld [smem:[#allocation2 + $0x2d]]  ;;  %v507_v17 = vmax.f32 %v142_v10, 0.0  ;;  %v170_v18 = vadd.f32 %v169_v15, %v168_v12  ;;  %v183_v19 = vstv %s489_s20 }
  0x31   :  { %s510_s26 = sld [smem:[#allocation2 + $0x30]]  ;;  %v512_v20 = vmax.f32 %v156_v14, 0.0  ;;  %v184_v21 = vadd.f32 %v183_v19, %v182_v16  ;;  %v186_v22 = vstv %s492_s1 }
  0x32   :  { %v515_v23 = vmax.f32 %v170_v18, 0.0  ;;  %v187_v24 = vmul.f32 %v186_v22, %v501_v9  ;;  %v188_v25 = vstv %s495_s21  ;;  %s303_s27 = sld [smem:[#allocation2 + $0x1f]] }
  0x33   :  { %v519_v26 = vmax.f32 %v184_v21, 0.0  ;;  %v189_v27 = vmul.f32 %v188_v25, %v504_v13  ;;  %v191_v28 = vstv %s498_s22  ;;  %s306_s28 = sld [smem:[#allocation2 + $0x22]] }
  0x34   :  { %v192_v29 = vmul.f32 %v191_v28, %v507_v17  ;;  %v193_v30 = vstv %s311_s23  ;;  %s309_s29 = sld [smem:[#allocation2 + $0x25]] }
  0x35   :  { %v190_v31 = vadd.f32 %v189_v27, %v187_v24  ;;  %v194_v32 = vmul.f32 %v193_v30, %v512_v20  ;;  %v196_v33 = vstv %s314_s24  ;;  %s312_s30 = sld [smem:[#allocation2 + $0x28]] }
  0x36   :  { %v197_v34 = vmul.f32 %v196_v33, %v515_v23  ;;  %v198_v35 = vstv %s317_s25  ;;  %s315_s3 = sld [smem:[#allocation2 + $0x2b]] }
  0x37   :  { %v195_v36 = vadd.f32 %v194_v32, %v192_v29  ;;  %v199_v37 = vmul.f32 %v198_v35, %v519_v26  ;;  %s318_s4 = sld [smem:[#allocation2 + $0x2e]]  ;;  %v203_v43 = vstv %s510_s26 }
  0x38   :  { %s527_s5 = sld [smem:[#allocation2 + $0x31]]  ;;  %v206_v38 = vstv %s303_s27 }
  0x39   :  { %v200_v39 = vadd.f32 %v199_v37, %v197_v34  ;;  %v201_v40 = vadd.f32 %v195_v36, %v190_v31  ;;  %v207_v41 = vmul.f32 %v206_v38, %v501_v9  ;;  %v208_v42 = vstv %s306_s28  ;;  %s304_s6 = sld [smem:[#allocation2 + $0x20]] }
  0x3a   :  { %v209_v44 = vmul.f32 %v208_v42, %v504_v13  ;;  %v211_v45 = vstv %s309_s29  ;;  %s307_s7 = sld [smem:[#allocation2 + $0x23]] }
  0x3b   :  { %v202_v46 = vadd.f32 %v201_v40, %v200_v39  ;;  %v212_v47 = vmul.f32 %v211_v45, %v507_v17  ;;  %v213_v48 = vstv %s312_s30  ;;  %s310_s8 = sld [smem:[#allocation2 + $0x26]] }
  0x3c   :  { %v210_v49 = vadd.f32 %v209_v44, %v207_v41  ;;  %v214_v50 = vmul.f32 %v213_v48, %v512_v20  ;;  %v216_v51 = vstv %s315_s3  ;;  %s313_s9 = sld [smem:[#allocation2 + $0x29]] }
  0x3d   :  { %v204_v52 = vadd.f32 %v203_v43, %v202_v46  ;;  %v217_v53 = vmul.f32 %v216_v51, %v515_v23  ;;  %v218_v54 = vstv %s318_s4  ;;  %s316_s10 = sld [smem:[#allocation2 + $0x2c]] }
  0x3e   :  { %v215_v55 = vadd.f32 %v214_v50, %v212_v47  ;;  %v219_v56 = vmul.f32 %v218_v54, %v519_v26  ;;  %s319_s11 = sld [smem:[#allocation2 + $0x2f]]  ;;  %v223_v62 = vstv %s527_s5 }
  0x3f   :  { %205 = vst [vmem:[#allocation7] sm:$0xff] %v204_v52  ;;  %v227_v57 = vstv %s304_s6  ;;  %s322_s12 = sld [smem:[#allocation2 + $0x32]] }
  0x40   :  { %v220_v58 = vadd.f32 %v219_v56, %v217_v53  ;;  %v221_v59 = vadd.f32 %v215_v55, %v210_v49  ;;  %v228_v60 = vmul.f32 %v227_v57, %v501_v9  ;;  %v229_v61 = vstv %s307_s7 }
  0x41   :  { %v230_v63 = vmul.f32 %v229_v61, %v504_v13  ;;  %v232_v0 = vstv %s310_s8 }
  0x42   :  { %v222_v1 = vadd.f32 %v221_v59, %v220_v58  ;;  %v233_v2 = vmul.f32 %v232_v0, %v507_v17  ;;  %v234_v3 = vstv %s313_s9 }
  0x43   :  { %v231_v4 = vadd.f32 %v230_v63, %v228_v60  ;;  %v235_v5 = vmul.f32 %v234_v3, %v512_v20  ;;  %v237_v6 = vstv %s316_s10 }
  0x44   :  { %v224_v7 = vadd.f32 %v223_v62, %v222_v1  ;;  %v238_v8 = vmul.f32 %v237_v6, %v515_v23  ;;  %v239_v10 = vstv %s319_s11 }
  0x45   :  { %v236_v11 = vadd.f32 %v235_v5, %v233_v2  ;;  %v240_v9 = vmul.f32 %v239_v10, %v519_v26  ;;  %v244_v13 = vstv %s322_s12 }
  0x46   :  { %226 = vst [vmem:[#allocation7 + $0x8] sm:$0xff] %v224_v7 }
  0x47   :  { %v241_v12 = vadd.f32 %v240_v9, %v238_v8  ;;  %v242_v14 = vadd.f32 %v236_v11, %v231_v4 }
  0x49   :  { %v243_v15 = vadd.f32 %v242_v14, %v241_v12 }
  0x4b   :  { %v245_v16 = vadd.f32 %v244_v13, %v243_v15 }
  0x4d   :  { %247 = vst [vmem:[#allocation7 + $0x10] sm:$0xff] %v245_v16 }
  0x4e   :  { %260 = dma.vmem_to_hbm [thread:$0]  %s253_s14, 384, %s255_s17, [#allocation4], %s396_s18, %s396_s18, %s397_s19  }
  0x4f   :  { %392 = dma.done.wait [#allocation4], 384  }
  0x50   :  { %393 = vsyncadd [#allocation4], 4294966912 }
  0x51   :  { %265 = vsyncpa [#allocation3], 1 }
  0x52   :  { %266 = vsyncpa [#allocation4], 1 }
  0x53   :  { %267 = vsyncpa [#allocation5], 1 }

</bundles_post_ra>
